<compile_context>
chip_gen: v7x
topology: tpu7x:2x2x1
jax: 0.10.0
libtpu: 0.0.40
codegen_flags: <defaults>
</compile_context>

<pallas_src>
import functools
import math

import jax
import jax.numpy as jnp
from jax.experimental import pallas as pl
from jax.experimental.pallas import tpu as pltpu

BN_EPS = 1e-5
MAX_LANE_TILE = 4096          # lanes per grid step (multiple of 128)

_CPARAMS = pltpu.CompilerParams(
    dimension_semantics=("parallel", "arbitrary"),
    vmem_limit_bytes=32 * 1024 * 1024,
)


# --------------------------------------------------------------------------
# Pallas kernels
# --------------------------------------------------------------------------

def _conv_stats_kernel(s_ref, w_ref, sum_ref, sq_ref, acc_y, acc_y2,
                       *, hw, t_hw, has_pad):
    """Pass 1: y = w @ s (1x1 conv) and per-channel sum / sum-of-squares."""
    j = pl.program_id(1)

    @pl.when(j == 0)
    def _():
        acc_y[...] = jnp.zeros_like(acc_y)
        acc_y2[...] = jnp.zeros_like(acc_y2)

    # (Ct, Cs) @ (Cs, t_hw) -> (Ct, t_hw); f32 accumulation on the MXU.
    y = jnp.dot(w_ref[...], s_ref[...], preferred_element_type=jnp.float32)
    if has_pad:
        lane = jax.lax.broadcasted_iota(jnp.int32, y.shape, 1)
        y = jnp.where(j * t_hw + lane < hw, y, 0.0)

    # Elementwise accumulation only (pure VPU); cross-lane reduce once at end.
    acc_y[...] += y
    acc_y2[...] += y * y

    @pl.when(j == pl.num_programs(1) - 1)
    def _():
        sum_ref[...] = jnp.sum(acc_y[...], axis=1, keepdims=True)
        sq_ref[...] = jnp.sum(acc_y2[...], axis=1, keepdims=True)


def _bn_loss_kernel(s_ref, t_ref, w_ref, scale_ref, shift_ref, margin_ref,
                    loss_ref, acc, *, hw, t_hw, has_pad):
    """Pass 2: recompute conv, apply folded BN (scale/shift), margin loss."""
    j = pl.program_id(1)

    @pl.when(j == 0)
    def _():
        acc[...] = jnp.zeros_like(acc)

    y = jnp.dot(w_ref[...], s_ref[...], preferred_element_type=jnp.float32)
    s_bn = y * scale_ref[...] + shift_ref[...]          # folded BatchNorm
    tgt = jnp.maximum(t_ref[...], margin_ref[...])
    diff = s_bn - tgt
    mask = ((s_bn > tgt) | (tgt > 0.0)).astype(jnp.float32)
    contrib = diff * diff * mask
    if has_pad:
        lane = jax.lax.broadcasted_iota(jnp.int32, contrib.shape, 1)
        contrib = jnp.where(j * t_hw + lane < hw, contrib, 0.0)

    acc[...] += contrib                                 # elementwise, no reduce

    @pl.when(j == pl.num_programs(1) - 1)
    def _():
        col = jnp.sum(acc[...], axis=1, keepdims=True)  # (Ct, 1)
        loss_ref[...] = jnp.sum(col, axis=0, keepdims=True)  # (1, 1)


# --------------------------------------------------------------------------
# Per-stage wrapper: conv + BN(train stats) + margin loss, fully fused
# --------------------------------------------------------------------------

def connector_distill_loss(s_feat, t_feat, w, gamma, beta, margin):
    """s_feat: (N, Cs, H, W); t_feat: (N, Ct, H, W); w: (Ct, Cs);
    gamma/beta/margin: (Ct,).  Returns the scalar stage loss."""
    N, Cs, H, W = s_feat.shape
    Ct = t_feat.shape[1]
    hw = H * W
    s3 = s_feat.reshape(N, Cs, hw)
    t3 = t_feat.reshape(N, Ct, hw)

    t_hw = hw if hw <= MAX_LANE_TILE else MAX_LANE_TILE
    n_tiles = pl.cdiv(hw, t_hw)
    has_pad = (hw % t_hw) != 0

    # ---- pass 1: conv + per-channel sums (per-batch partials; "parallel") ----
    sums, sqs = pl.pallas_call(
        functools.partial(_conv_stats_kernel, hw=hw, t_hw=t_hw, has_pad=has_pad),
        out_shape=(jax.ShapeDtypeStruct((N, Ct, 1), jnp.float32),
                   jax.ShapeDtypeStruct((N, Ct, 1), jnp.float32)),
        grid=(N, n_tiles),
        in_specs=[pl.BlockSpec((None, Cs, t_hw), lambda n, j: (n, 0, j)),
                  pl.BlockSpec((Ct, Cs), lambda n, j: (0, 0))],
        out_specs=(pl.BlockSpec((None, Ct, 1), lambda n, j: (n, 0, 0)),
                   pl.BlockSpec((None, Ct, 1), lambda n, j: (n, 0, 0))),
        scratch_shapes=[pltpu.VMEM((Ct, t_hw), jnp.float32),
                        pltpu.VMEM((Ct, t_hw), jnp.float32)],
        compiler_params=_CPARAMS,
    )(s3, w)

    # BN training-mode statistics (biased var) folded into scale/shift in JAX.
    # NOTE: one-pass E[x^2]-E[x]^2 in f32, clamped at 0 to guard against
    # cancellation for very large N*H*W (a true two-pass variance would need a
    # third sweep over the data).
    cnt = float(N * hw)
    mean = jnp.sum(sums, axis=0)[:, 0] / cnt
    var = jnp.maximum(jnp.sum(sqs, axis=0)[:, 0] / cnt - mean * mean, 0.0)
    inv = jax.lax.rsqrt(var + BN_EPS)
    scale = (gamma * inv).reshape(Ct, 1)
    shift = (beta - mean * gamma * inv).reshape(Ct, 1)
    margin2 = margin.reshape(Ct, 1)

    # ---- pass 2: conv recompute + BN affine + margin loss ----
    loss_parts = pl.pallas_call(
        functools.partial(_bn_loss_kernel, hw=hw, t_hw=t_hw, has_pad=has_pad),
        out_shape=jax.ShapeDtypeStruct((N, 1, 1), jnp.float32),
        grid=(N, n_tiles),
        in_specs=[pl.BlockSpec((None, Cs, t_hw), lambda n, j: (n, 0, j)),
                  pl.BlockSpec((None, Ct, t_hw), lambda n, j: (n, 0, j)),
                  pl.BlockSpec((Ct, Cs), lambda n, j: (0, 0)),
                  pl.BlockSpec((Ct, 1), lambda n, j: (0, 0)),
                  pl.BlockSpec((Ct, 1), lambda n, j: (0, 0)),
                  pl.BlockSpec((Ct, 1), lambda n, j: (0, 0))],
        out_specs=pl.BlockSpec((None, 1, 1), lambda n, j: (n, 0, 0)),
        scratch_shapes=[pltpu.VMEM((Ct, t_hw), jnp.float32)],
        compiler_params=_CPARAMS,
    )(s3, t3, w, scale, shift, margin2)

    return jnp.sum(loss_parts)


# --------------------------------------------------------------------------
# Parameter setup (deterministic, mirrors the PyTorch __init__)
# --------------------------------------------------------------------------

def _norm_cdf(x):
    return 0.5 * (1.0 + math.erf(x / math.sqrt(2.0)))


def get_margin_from_bn(gamma, beta):
    """Python port of get_margin_from_BN (scipy.norm.cdf via math.erf)."""
    margins = []
    for s, m in zip(gamma.tolist(), beta.tolist()):
        s = abs(s)
        c = _norm_cdf(-m / s)
        if c > 0.001:
            margins.append(-s * math.exp(-(m / s) ** 2 / 2.0)
                           / math.sqrt(2.0 * math.pi) / c + m)
        else:
            margins.append(-3.0 * s)
    return jnp.asarray(margins, dtype=jnp.float32)


class Distiller:
    """Connector (1x1 conv + BN) + margin distillation loss, Pallas hot path."""

    def __init__(self, t_channels, s_channels, teacher_bn_params, key):
        self.feat_num = len(t_channels)
        self.conv_w = []     # (Ct, Cs): same layout as torch Conv2d weight
        self.bn_gamma = []   # connector BN weight, init 1
        self.bn_beta = []    # connector BN bias,  init 0
        self.margins = []    # (Ct,) per stage, from teacher BN params
        for i, (tc, sc) in enumerate(zip(t_channels, s_channels)):
            key, sub = jax.random.split(key)
            n = 1 * 1 * tc   # kernel_size[0]*kernel_size[1]*out_channels
            self.conv_w.append(
                jax.random.normal(sub, (tc, sc), jnp.float32) * math.sqrt(2.0 / n))
            self.bn_gamma.append(jnp.ones((tc,), jnp.float32))
            self.bn_beta.append(jnp.zeros((tc,), jnp.float32))
            g, b = teacher_bn_params[i]
            self.margins.append(get_margin_from_bn(g, b))

    def __call__(self, t_feats, s_feats, s_out):
        # t_feats / s_feats: lists of NCHW float32 arrays.
        loss_distill = jnp.float32(0.0)
        for i in range(self.feat_num):
            li = connector_distill_loss(s_feats[i], t_feats[i], self.conv_w[i],
                                        self.bn_gamma[i], self.bn_beta[i],
                                        self.margins[i])
            loss_distill = loss_distill + li / (2 ** (self.feat_num - i - 1))
        return s_out, loss_distill


# --------------------------------------------------------------------------
# Demo
# --------------------------------------------------------------------------

if __name__ == "__main__":
    batch = 2
    s_channels = [8, 16]
    t_channels = [16, 32]
    spatial = [16, 8]
    num_classes = 10

    k = jax.random.PRNGKey(0)

    # Deterministic teacher BN-before-ReLU params (gamma, beta) per stage.
    teacher_bn_params = []
    for tc in t_channels:
        k, k1, k2 = jax.random.split(k, 3)
        gamma = jnp.abs(jax.random.normal(k1, (tc,), jnp.float32)) + 0.5
        beta = 0.1 * jax.random.normal(k2, (tc,), jnp.float32)
        teacher_bn_params.append((gamma, beta))

    distiller = Distiller(t_channels, s_channels, teacher_bn_params,
                          jax.random.PRNGKey(1))

    # Synthetic teacher/student feature maps and student logits (see TODO).
    t_feats, s_feats = [], []
    for i, hw in enumerate(spatial):
        k, k1, k2 = jax.random.split(k, 3)
        t_feats.append(jax.random.normal(
            k1, (batch, t_channels[i], hw, hw), jnp.float32))
        s_feats.append(jax.random.normal(
            k2, (batch, s_channels[i], hw, hw), jnp.float32))
    k, k1 = jax.random.split(k)
    s_out = jax.random.normal(k1, (batch, num_classes), jnp.float32)

    s_out_r, loss_distill = distiller(t_feats, s_feats, s_out)
    jax.block_until_ready((s_out_r, loss_distill))
    print("KERNEL_OK")
</pallas_src>

<mosaic_0001>
module attributes {stable_mosaic.version = 11 : i64} {
  func.func @_conv_stats_kernel(%arg0: i32, %arg1: i32, %arg2: memref<1x8x256xf32, #tpu.memory_space<vmem>>, %arg3: memref<16x8xf32, #tpu.memory_space<vmem>>, %arg4: memref<1x16x1xf32, #tpu.memory_space<vmem>>, %arg5: memref<1x16x1xf32, #tpu.memory_space<vmem>>, %arg6: memref<16x256xf32, #tpu.memory_space<vmem>>, %arg7: memref<16x256xf32, #tpu.memory_space<vmem>>) attributes {dimension_semantics = [#tpu.dimension_semantics<parallel>, #tpu.dimension_semantics<arbitrary>], iteration_bounds = array<i64: 2, 1>, scalar_prefetch = 0 : i64, scratch_operands = 2 : i64, tpu.core_type = #tpu.core_type<tc>, window_params = [{transform_indices = @transform_0, window_bounds = array<i64: 1, 8, 256>}, {pipeline_mode = #tpu.pipeline_mode<synchronous>, transform_indices = @transform_1, window_bounds = array<i64: 16, 8>}, {transform_indices = @transform_2, window_bounds = array<i64: 1, 16, 1>}, {transform_indices = @transform_3, window_bounds = array<i64: 1, 16, 1>}]} {
    %c0_i32 = arith.constant 0 : i32
    %0 = arith.cmpi eq, %arg1, %c0_i32 : i32
    %1 = arith.extui %0 : i1 to i32
    %c0_i32_0 = arith.constant 0 : i32
    %2 = arith.cmpi ne, %1, %c0_i32_0 : i32
    scf.if %2 {
      %cst_15 = arith.constant 0.000000e+00 : f32
      %17 = vector.broadcast %cst_15 : f32 to vector<16x256xf32>
      %c0_16 = arith.constant 0 : index
      %c0_17 = arith.constant 0 : index
      %18 = vector.load %arg6[%c0_16, %c0_17] : memref<16x256xf32, #tpu.memory_space<vmem>>, vector<16x256xf32>
      tpu.vector_store %arg6[%c0_16, %c0_17], %17 {strides = array<i32>} : memref<16x256xf32, #tpu.memory_space<vmem>>, vector<16x256xf32>,
      %cst_18 = arith.constant 0.000000e+00 : f32
      %19 = vector.broadcast %cst_18 : f32 to vector<16x256xf32>
      %c0_19 = arith.constant 0 : index
      %c0_20 = arith.constant 0 : index
      %20 = vector.load %arg7[%c0_19, %c0_20] : memref<16x256xf32, #tpu.memory_space<vmem>>, vector<16x256xf32>
      tpu.vector_store %arg7[%c0_19, %c0_20], %19 {strides = array<i32>} : memref<16x256xf32, #tpu.memory_space<vmem>>, vector<16x256xf32>,
    } else {
    }
    %c0 = arith.constant 0 : index
    %c0_1 = arith.constant 0 : index
    %3 = vector.load %arg3[%c0, %c0_1] : memref<16x8xf32, #tpu.memory_space<vmem>>, vector<16x8xf32>
    %c0_2 = arith.constant 0 : index
    %c0_3 = arith.constant 0 : index
    %c0_4 = arith.constant 0 : index
    %4 = vector.load %arg2[%c0_2, %c0_3, %c0_4] : memref<1x8x256xf32, #tpu.memory_space<vmem>>, vector<1x8x256xf32>
    %5 = vector.shape_cast %4 : vector<1x8x256xf32> to vector<8x256xf32>
    %cst = arith.constant dense<0.000000e+00> : vector<16x256xf32>
    %6 = tpu.matmul %3, %5, %cst {dimension_numbers = #tpu.dot_dimension_numbers<[1], [0], [0], [1], [0, 0, 1, 1], [], []>} : vector<16x8xf32>, vector<8x256xf32>, vector<16x256xf32> -> vector<16x256xf32>
    %c0_5 = arith.constant 0 : index
    %c0_6 = arith.constant 0 : index
    %7 = vector.load %arg6[%c0_5, %c0_6] : memref<16x256xf32, #tpu.memory_space<vmem>>, vector<16x256xf32>
    %8 = arith.addf %7, %6 : vector<16x256xf32>
    %c0_7 = arith.constant 0 : index
    %c0_8 = arith.constant 0 : index
    %9 = vector.load %arg6[%c0_7, %c0_8] : memref<16x256xf32, #tpu.memory_space<vmem>>, vector<16x256xf32>
    tpu.vector_store %arg6[%c0_7, %c0_8], %8 {strides = array<i32>} : memref<16x256xf32, #tpu.memory_space<vmem>>, vector<16x256xf32>,
    %c0_9 = arith.constant 0 : index
    %c0_10 = arith.constant 0 : index
    %10 = vector.load %arg7[%c0_9, %c0_10] : memref<16x256xf32, #tpu.memory_space<vmem>>, vector<16x256xf32>
    %11 = arith.mulf %6, %6 : vector<16x256xf32>
    %12 = arith.addf %10, %11 : vector<16x256xf32>
    %c0_11 = arith.constant 0 : index
    %c0_12 = arith.constant 0 : index
    %13 = vector.load %arg7[%c0_11, %c0_12] : memref<16x256xf32, #tpu.memory_space<vmem>>, vector<16x256xf32>
    tpu.vector_store %arg7[%c0_11, %c0_12], %12 {strides = array<i32>} : memref<16x256xf32, #tpu.memory_space<vmem>>, vector<16x256xf32>,
    %c0_i32_13 = arith.constant 0 : i32
    %14 = arith.cmpi eq, %arg1, %c0_i32_13 : i32
    %15 = arith.extui %14 : i1 to i32
    %c0_i32_14 = arith.constant 0 : i32
    %16 = arith.cmpi ne, %15, %c0_i32_14 : i32
    scf.if %16 {
      %c0_15 = arith.constant 0 : index
      %c0_16 = arith.constant 0 : index
      %17 = vector.load %arg6[%c0_15, %c0_16] : memref<16x256xf32, #tpu.memory_space<vmem>>, vector<16x256xf32>
      %cst_17 = arith.constant dense<0.000000e+00> : vector<16xf32>
      %18 = vector.multi_reduction <add>, %17, %cst_17 [1] : vector<16x256xf32> to vector<16xf32>
      %19 = vector.shape_cast %18 : vector<16xf32> to vector<16x1xf32>
      %c0_18 = arith.constant 0 : index
      %c0_19 = arith.constant 0 : index
      %c0_20 = arith.constant 0 : index
      %20 = vector.load %arg4[%c0_18, %c0_19, %c0_20] : memref<1x16x1xf32, #tpu.memory_space<vmem>>, vector<1x16x1xf32>
      %21 = vector.shape_cast %20 : vector<1x16x1xf32> to vector<16x1xf32>
      %22 = vector.shape_cast %19 : vector<16x1xf32> to vector<1x16x1xf32>
      tpu.vector_store %arg4[%c0_18, %c0_19, %c0_20], %22 {strides = array<i32>} : memref<1x16x1xf32, #tpu.memory_space<vmem>>, vector<1x16x1xf32>,
      %c0_21 = arith.constant 0 : index
      %c0_22 = arith.constant 0 : index
      %23 = vector.load %arg7[%c0_21, %c0_22] : memref<16x256xf32, #tpu.memory_space<vmem>>, vector<16x256xf32>
      %cst_23 = arith.constant dense<0.000000e+00> : vector<16xf32>
      %24 = vector.multi_reduction <add>, %23, %cst_23 [1] : vector<16x256xf32> to vector<16xf32>
      %25 = vector.shape_cast %24 : vector<16xf32> to vector<16x1xf32>
      %c0_24 = arith.constant 0 : index
      %c0_25 = arith.constant 0 : index
      %c0_26 = arith.constant 0 : index
      %26 = vector.load %arg5[%c0_24, %c0_25, %c0_26] : memref<1x16x1xf32, #tpu.memory_space<vmem>>, vector<1x16x1xf32>
      %27 = vector.shape_cast %26 : vector<1x16x1xf32> to vector<16x1xf32>
      %28 = vector.shape_cast %25 : vector<16x1xf32> to vector<1x16x1xf32>
      tpu.vector_store %arg5[%c0_24, %c0_25, %c0_26], %28 {strides = array<i32>} : memref<1x16x1xf32, #tpu.memory_space<vmem>>, vector<1x16x1xf32>,
    } else {
    }
    return
  }
  func.func @transform_0(%arg0: i32, %arg1: i32) -> (i32, i32, i32) {
    %c0_i32 = arith.constant 0 : i32
    %c0_i32_0 = arith.constant 0 : i32
    return %arg0, %c0_i32, %arg1 : i32, i32, i32
  }
  func.func @transform_1(%arg0: i32, %arg1: i32) -> (i32, i32) {
    %c0_i32 = arith.constant 0 : i32
    %c0_i32_0 = arith.constant 0 : i32
    %c0_i32_1 = arith.constant 0 : i32
    return %c0_i32, %c0_i32_0 : i32, i32
  }
  func.func @transform_2(%arg0: i32, %arg1: i32) -> (i32, i32, i32) {
    %c0_i32 = arith.constant 0 : i32
    %c0_i32_0 = arith.constant 0 : i32
    %c0_i32_1 = arith.constant 0 : i32
    return %arg0, %c0_i32, %c0_i32_0 : i32, i32, i32
  }
  func.func @transform_3(%arg0: i32, %arg1: i32) -> (i32, i32, i32) {
    %c0_i32 = arith.constant 0 : i32
    %c0_i32_0 = arith.constant 0 : i32
    %c0_i32_1 = arith.constant 0 : i32
    return %arg0, %c0_i32, %c0_i32_0 : i32, i32, i32
  }
}

</mosaic_0001>

<bundles_post_ra>
// kernel: tpu_custom_call.1
= control target key start
LH: loop header
LB: loop body
LE: loop exit
PB: predicated region body
PF: predicated region fallthrough
CT: control target
= control target key end

     0   :  { %9 = vsyncpa [#allocation5], 0  ;;  %s802_s0 = inlined_call_operand.hbm [shape: f32[2,8,256], index: 0, kind: input, shape index: {}]   ;;  %s803_s1 = inlined_call_operand.vmem [shape: f32[16,8], index: 1, kind: input, shape index: {}]   ;;  %s804_s2 = inlined_call_operand.vmem [shape: f32[2,16,1], index: 2, kind: output, shape index: {0}]   ;;  %s805_s3 = inlined_call_operand.vmem [shape: f32[2,16,1], index: 3, kind: output, shape index: {1}]  }
   0x1   :  { %11 = vsyncpa [#allocation5 + $0x1], 0  ;;  %s668_s12 = smov 0   ;;  %s670_s13 = smov 0  }
   0x2   :  { %s672_s14 = smov 0   ;;  %s674_s15 = smov 0  }
   0x3   :  { %s676_s16 = smov 0   ;;  %s678_s17 = smov 0  }
   0x4 LB: > { %s486_s18 = sadd.s32 4294967295, %s644_s17   ;;  %s29_s19 = sadd.s32 1, %s640_s16  ;;  %s644_s17 = sphi %s678_s17, %s17_s17   ;;  %s640_s16 = sphi %s676_s16, %s815_s16   ;;  %s636_s15 = sphi %s674_s15, %s814_s15   ;;  %s632_s14 = sphi %s672_s14, %s813_s14   ;;  %s628_s13 = sphi %s670_s13, %s812_s13   ;;  %s624_s12 = sphi %s668_s12, %s811_s12  }
   0x5   : > { %p31_p0 = scmp.ge.s32.totalorder %s29_s19, 2  ;;  %s38_s20 = sadd.s32 1, %s632_s14 }
   0x6   : > { %p45_p1 = scmp.ne.s32.totalorder %s632_s14, %s628_s13  ;;  %p46_p2 = scmp.eq.s32.totalorder %s644_s17, 0 }
   0x7   : > { %s817_s19 = smov (%p31_p0, %s29_s19), 0  ;;  %p51_p4 = scmp.ne.s32.totalorder %s628_s13, %s624_s12 }
   0x8   : > { %p704_p3 = por %p46_p2, %p45_p1  ;;  %s33_s22 = ssub.s32 %s640_s16, %s817_s19 }
   0x9   : > { %p52_p5 = scmp.eq.s32.totalorder %s486_s18, 0  ;;  %p36_p6 = scmp.eq.s32.totalorder %s33_s22, 0 }
   0xa   : > { %p514_p8 = scmp.lt.s32.totalorder %s644_s17, 2  ;;  %s151_s25 = sand.u32 1, %s632_s14  }
   0xb   : > { %p711_p7 = por %p52_p5, %p51_p4  ;;  %s503_s26 = sshll.u32 %s640_s16, 8 }
   0xc   : > { %s717_s24 = scalar_select %p36_p6, %s632_s14, %s38_s20  }
   0xd   : > { %s490_s27 = sshll.u32 %s151_s25, 4  ;;  %s724_s30 = scalar_lea.hbm %s802_s0, %s503_s26 }
   0xe   : > { %s155_s4 = scalar_lea.vmem [#allocation4], %s490_s27  ;;  %p728_p9 = pnand %p514_p8, %p704_p3 }
   0xf   : > { %s165_s5 = sshll.u32 %s155_s4, 4  ;;  %s152_s7 = scalar_lea.sflag [#allocation5], %s151_s25  ;;  %s732_s5 = int_to_ptr.vmem [resolvable:$true] %s165_s5 }
  0x10   : > { %s564_s8 = scalar_lea.hbm %s724_s30, 256  ;;  %p566_p13 = pneg %p728_p9 }
  0x11   : > { %p565_p12 = scmp.ne.s32.totalorder %s724_s30, %s564_s8  ;;  %s569_s11 = scalar_lea.hbm %s802_s0, 512 }
  0x12   : > { %p570_p2 = scmp.lt.u32.totalorder %s724_s30, %s802_s0  ;;  %p571_p3 = scmp.lt.u32.totalorder %s569_s11, %s564_s8 }
  0x13   : > { %p567_p0 = pnand %p566_p13, %p565_p12  ;;  %p573_p5 = scmp.lt.u32.totalorder %s564_s8, %s724_s30 }
  0x14   : > { %p572_p4 = por %p571_p3, %p570_p2 }
  0x15   : > { %p568_p1 = pneg %p567_p0 }
  0x16   : > { %p574_p6 = por %p573_p5, %p572_p4 }
  0x18   : > { %p575_p8 = pnand %p574_p6, %p568_p1 }
  0x1a   : > { %578 = shalt.err (!%p575_p8)
}
  0x1b   : > { %s579_s20 = scalar_lea.vmem %s732_s5, 256  ;;  %s646_s21 = smov [#allocation4]  }
  0x1c   : > { %p580_p12 = scmp.ne.s32.totalorder %s732_s5, %s579_s20  ;;  %s584_s22 = sshll.u32 %s646_s21, 4  ;;  %s585_s22 = int_to_ptr.vmem [resolvable:$false] %s584_s22 }
  0x1d   : > { %s586_s25 = scalar_lea.vmem %s585_s22, 512  ;;  %p587_p11 = scmp.lt.s32.totalorder %s732_s5, %s585_s22 }
  0x1e   : > { %p582_p0 = pnand %p580_p12, %p566_p13  ;;  %p588_p2 = scmp.lt.s32.totalorder %s586_s25, %s579_s20 }
  0x20   : > { %p583_p10 = pneg %p582_p0  ;;  %p589_p3 = por %p588_p2, %p587_p11 }
  0x22   : > { %p590_p4 = pnand %p589_p3, %p583_p10 }
  0x24   : > { %593 = shalt.err (!%p590_p4)
}
  0x25   : > { %513 = dma.hbm_to_vmem [thread:$0]  (!%p728_p9), %s724_s30, 256, %s732_s5, %s152_s7  }
  0x26   : > { %p809_p1 = scmp.lt.s32.totalorder %s644_s17, 3  ;;  %p810_p5 = scmp.ge.s32.totalorder %s644_s17, 1 }
  0x28   : > { %p171_p13 = pnand %p810_p5, %p809_p1 }
  0x29   : > { %s176_s26 = sand.u32 (!%p171_p13), 1, %s628_s13  }
  0x2a   : > { %174 = sbr.rel (%p171_p13) target bundleno = 418 (0x1a2), region = 28  ;;  %s494_s27 = sshll.u32 (!%p171_p13), %s176_s26, 4 }
  0x2b   : > { %s177_s28 = scalar_lea.sflag (!%p171_p13), [#allocation5], %s176_s26  ;;  %s180_s29 = scalar_lea.vmem (!%p171_p13), [#allocation4], %s494_s27 }
  0x31   : > { %619 = dma.done.wait (%p711_p7), %s177_s28, 256  }
  0x32   : > { %621 = vsyncadd (%p711_p7), %s177_s28, 4294967040  ;;  %v647_v0 = vmov 0.0   ;;  %v234_v1 = vld [vmem:[%s180_s29 + $0x8] sm:$0xff]  ;;  %v233_v2 = vld [vmem:[%s180_s29] sm:$0xff]  ;;  %vm235_vm0 = vcmask 64512   ;;  %p209_p7 = scmp.lt.s32.totalorder %s636_s15, 1 }
  0x33   : > { %306 = vmatprep.mubr.f32.mxu0 %v647_v0  ;;  %312 = vmatprep.mubr.f32.mxu1 %v647_v0  ;;  %v231_v3 = vld [vmem:[%s803_s1] sm:$0xff]  ;;  %v232_v4 = vld [vmem:[%s803_s1 + $0x8] sm:$0xff]  ;;  %vm360_vm1 = vcmask 7168  }
  0x34   : > { %242 = vmatprep.subr.mxu0 %v234_v1  ;;  %506 = vmatprep.subr.mxu1 %v234_v1  ;;  %s819_s15 = smov (!%p209_p7, %s636_s15), 1 }
  0x35   : > { %243 = vmatpush1.msra.mxu0 %v233_v2  ;;  %507 = vmatpush1.msra.mxu1 %v233_v2  ;;  %s504_s23 = sshll.u32 %s819_s15, 4 }
  0x36   : > { %499 = vmatmul.mubr.msk.f32.vlgmr.msra.gmra.mrb[0].mxu0 %vm235_vm0, %v231_v3  ;;  %500 = vmatmul.mubr.msk.f32.vlgmr.msra.gmra.mrb[0].mxu1 %vm235_vm0, %v232_v4  ;;  %s213_s9 = scalar_lea.vmem %s804_s2, %s504_s23  ;;  %s218_s12 = scalar_lea.vmem %s805_s3, %s504_s23 }
 0x109   : > { %v308_v5 = vpop.f32.mrb[0].mxu0  ;;  %v314_v6 = vpop.f32.mrb[0].mxu1 }
 0x10a   : > { %v335_v7 = vmul.f32 %v308_v5, %v308_v5  ;;  %v310_v8 = vpop.f32.mrb[1].mxu0  ;;  %v337_v9 = vmul.f32 %v314_v6, %v314_v6  ;;  %v316_v10 = vpop.f32.mrb[1].mxu1 }
 0x10b   : > { %v336_v11 = vmul.f32 %v310_v8, %v310_v8  ;;  %v338_v12 = vmul.f32 %v316_v10, %v316_v10  ;;  %v357_v13 = vadd.f32 %v316_v10, %v314_v6  ;;  %v354_v14 = vadd.f32 %v310_v8, %v308_v5 }
 0x10d   : > { %355 = vadd.xlane.f32.xlu0 %v354_v14  ;;  %v367_v15 = vadd.f32 %v336_v11, %v335_v7  ;;  %v370_v16 = vadd.f32 %v338_v12, %v337_v9 }
 0x10f   : > { %368 = vadd.xlane.f32.xlu1 %v367_v15 }
 0x111   : > { %358 = vadd.xlane.f32.xlu0 %v357_v13 }
 0x113   : > { %371 = vadd.xlane.f32.xlu1 %v370_v16 }
 0x19a   : > { %v356_v17 = vpop.xlane.xlu0 %355 }
 0x19b   : > { %361 = vst.msk [vmem:[%s213_s9] sm:$0xff] %vm360_vm1, %v356_v17 }
 0x19c   : > { %v369_v18 = vpop.xlane.xlu1 %368 }
 0x19d   : > { %373 = vst.msk [vmem:[%s218_s12] sm:$0xff] %vm360_vm1, %v369_v18 }
 0x19e   : > { %v359_v19 = vpop.xlane.xlu0 %358 }
 0x19f   : > { %362 = vst.msk [vmem:[%s213_s9 + $0x8] sm:$0xff] %vm360_vm1, %v359_v19 }
 0x1a0   : > { %v372_v20 = vpop.xlane.xlu1 %371 }
 0x1a1   : > { %374 = vst.msk [vmem:[%s218_s12 + $0x8] sm:$0xff] %vm360_vm1, %v372_v20 }
 0x1a2 PF: > { %s17_s17 = sadd.s32 1, %s644_s17   ;;  %s811_s12 = smov %s628_s13 }
 0x1a3   : > { %p14_p9 = scmp.ge.s32.totalorder %s17_s17, 4   ;;  %s812_s13 = smov %s632_s14 }
 0x1a4   : > { %s813_s14 = smov %s717_s24  ;;  %s814_s15 = smov %s640_s16 }
 0x1a5   : > { %s815_s16 = smov %s817_s19  ;;  %16 = sbr.rel (!%p14_p9) target bundleno = 4 (0x4), region = 88 }
 0x1ac   :  { %412 = vsyncpa [#allocation5], 1 }
 0x1ad   :  { %414 = vsyncpa [#allocation5 + $0x1], 1 }

</bundles_post_ra>
